<compile_context>
chip_gen: v6e
topology: v6e:2x2x1
jax: 0.10.0
libtpu: 0.0.40
codegen_flags: <defaults>
</compile_context>

<pallas_src>
import functools

import jax
import jax.numpy as jnp
import numpy as np
from jax.experimental import pallas as pl
from jax.experimental.pallas import tpu as pltpu

_GRIDLESS_MAX_B = 256
# Review: 512-1024-row tiles reach ~85% of HBM roofline while amortizing the
# ~0.35 us per-grid-step overhead; prefer 512, then 1024.
_TILE_B_CANDIDATES = (512, 1024, 256, 128)


def _ensemble_kernel(wvec_ref, x_ref, w_ref, b_ref, o_ref, *, num_models, num_classes):
    """Fused ensemble forward for one batch tile.

    wvec_ref : SMEM (M,)       f32 -- influence weights (index 0 never read)
    x_ref    : VMEM (TB, H)    f32 -- input tile
    w_ref    : VMEM (H, M*C)   f32 -- all member weight matrices, column-fused
    b_ref    : VMEM (1, M*C)   f32 -- all member biases, column-fused
    o_ref    : VMEM (TB, C)    f32 -- ensemble output tile (written once)
    """
    # One MXU matmul for all ensemble members: [TB, H] x [H, M*C] -> [TB, M*C].
    logits = jnp.dot(
        x_ref[...], w_ref[...], preferred_element_type=jnp.float32
    ) + b_ref[...]

    acc = None
    # Statically unrolled loop over ensemble members; slices are 128-lane aligned.
    for i in range(num_models):
        z = logits[:, i * num_classes:(i + 1) * num_classes]
        m = jnp.max(z, axis=-1, keepdims=True)                   # softmax over class axis
        e = jnp.exp(z - m)
        # Exact reciprocal (approx mode would break the 1e-5 rtol). Fold the scalar
        # ensemble weight into the [TB,1] reciprocal, not the [TB,C] softmax.
        inv = pl.reciprocal(jnp.sum(e, axis=-1, keepdims=True), approx=False)
        if i > 0:                       # model 0 has implicit weight 1.0 -> skip the mul
            inv = wvec_ref[i] * inv
        contrib = e * inv
        acc = contrib if acc is None else acc + contrib

    # Single unmasked, lane-dense store (C is a multiple of 128).
    o_ref[...] = acc.astype(o_ref.dtype)


def fuse_ensemble_params(W, b):
    """One-time relayout, hoisted out of the per-call path.

    W [M,H,C] -> W_fused [H, M*C] with W_fused[:, m*C + c] = W[m, :, c]
    b [M,1,C] -> b_fused [1, M*C]
    """
    M, H, C = W.shape
    W_fused = jnp.transpose(W, (1, 0, 2)).reshape(H, M * C)
    b_fused = b.reshape(1, M * C)
    return W_fused, b_fused


def _pick_tile_b(batch):
    for t in _TILE_B_CANDIDATES:
        if batch % t == 0:
            return t
    return None


def _gridded_call(kernel, out_shape, weights, x, W_fused, b_fused, *, tile_b,
                  single_buffer_weights):
    B, H = x.shape
    _, MC = W_fused.shape
    C = out_shape.shape[1]

    # Grid-invariant weight slabs: single-buffer them (saves 2x slab VMEM, matters on
    # v7x's 64 MiB / 32 MiB-scoped VMEM once H*M*C grows).
    weight_kwargs = {"pipeline_mode": pl.Buffered(1)} if single_buffer_weights else {}

    # Explicit VMEM budget: double-buffered x/out tiles + weight slabs + logits tile
    # (+ softmax temporaries), with generous margin. Clamped so we never exceed v7x's
    # physical 64 MiB per TensorCore.
    est = 4 * (2 * tile_b * H + 2 * tile_b * C + H * MC + MC + 3 * tile_b * MC)
    vmem_limit = int(min(max(4 * est, 16 << 20), 48 << 20))

    grid_spec = pltpu.PrefetchScalarGridSpec(
        num_scalar_prefetch=1,              # weights -> SMEM, passed to every index_map
        grid=(B // tile_b,),
        in_specs=[
            pl.BlockSpec((tile_b, H), lambda i, w: (i, 0)),               # x tile
            pl.BlockSpec((H, MC), lambda i, w: (0, 0), **weight_kwargs),  # fused W (const)
            pl.BlockSpec((1, MC), lambda i, w: (0, 0), **weight_kwargs),  # fused b (const)
        ],
        out_specs=pl.BlockSpec((tile_b, C), lambda i, w: (i, 0)),
    )
    return pl.pallas_call(
        kernel,
        out_shape=out_shape,
        grid_spec=grid_spec,
        compiler_params=pltpu.CompilerParams(
            dimension_semantics=("parallel",),   # batch grid shards across v7x's 2 TCs
            vmem_limit_bytes=vmem_limit,
        ),
    )(weights, x, W_fused, b_fused)


def ensemble_weighted_forward(x, W_fused, b_fused, weights, *, num_models, num_classes):
    """x: [B,H] f32, W_fused: [H,M*C], b_fused: [1,M*C], weights: [M] -> [B,C] f32."""
    B, H = x.shape
    M, C = num_models, num_classes
    MC = M * C
    assert W_fused.shape == (H, MC) and b_fused.shape == (1, MC)
    # The 128-lane-aligned per-model slices and unmasked lane-dense store assume this.
    assert C % 128 == 0, "num_classes must be a multiple of 128 (add a padded-C path otherwise)"

    kernel = functools.partial(_ensemble_kernel, num_models=M, num_classes=C)
    out_shape = jax.ShapeDtypeStruct((B, C), jnp.float32)

    tile_b = _pick_tile_b(B)
    if B <= _GRIDLESS_MAX_B or tile_b is None:
        # Tiny batch: everything resident, single invocation, no grid-step overhead.
        # TODO(synk): pad ragged B (> _GRIDLESS_MAX_B and not tile-divisible) instead of
        # falling back to the grid-less path.
        return pl.pallas_call(
            kernel,
            out_shape=out_shape,
            in_specs=[
                pl.BlockSpec(memory_space=pltpu.MemorySpace.SMEM),   # influence weights
                pl.BlockSpec(memory_space=pltpu.MemorySpace.VMEM),   # x
                pl.BlockSpec(memory_space=pltpu.MemorySpace.VMEM),   # fused W
                pl.BlockSpec(memory_space=pltpu.MemorySpace.VMEM),   # fused b
            ],
            out_specs=pl.BlockSpec(memory_space=pltpu.MemorySpace.VMEM),
        )(weights, x, W_fused, b_fused)

    # Realistic batch: batch-parallel grid. Try single-buffered weight slabs first;
    # fall back to default double-buffering if this build rejects Buffered(1).
    try:
        return _gridded_call(kernel, out_shape, weights, x, W_fused, b_fused,
                             tile_b=tile_b, single_buffer_weights=True)
    except Exception:
        return _gridded_call(kernel, out_shape, weights, x, W_fused, b_fused,
                             tile_b=tile_b, single_buffer_weights=False)


def _reference(x, W, b, weights):
    """Plain-JAX reference mirroring the PyTorch forward exactly."""
    def softmax1(z):
        z = z - jnp.max(z, axis=1, keepdims=True)
        e = jnp.exp(z)
        return e / jnp.sum(e, axis=1, keepdims=True)

    out = softmax1(x @ W[0] + b[0, 0])
    for i in range(1, W.shape[0]):
        out = out + weights[i] * softmax1(x @ W[i] + b[i, 0])
    return out


if __name__ == "__main__":
    M, H, C = 3, 32, 128

    key = jax.random.PRNGKey(0)
    kx, kw, kb, kx2 = jax.random.split(key, 4)

    W = jax.random.normal(kw, (M, H, C), dtype=jnp.float32) * 0.1
    b = jax.random.normal(kb, (M, 1, C), dtype=jnp.float32) * 0.1
    # influence weights (weights[0] is unused by the reference forward, just like torch)
    weights = jnp.array([1.0, 0.5, 0.25], dtype=jnp.float32)

    # One-time parameter fusion (hoisted out of the per-call path).
    W_fused, b_fused = fuse_ensemble_params(W, b)
    W_fused = jax.block_until_ready(W_fused)
    b_fused = jax.block_until_ready(b_fused)

    # 1) Tiny batch -> grid-less path.
    x_small = jax.random.normal(kx, (8, H), dtype=jnp.float32)
    out_small = jax.block_until_ready(
        ensemble_weighted_forward(x_small, W_fused, b_fused, weights,
                                  num_models=M, num_classes=C))
    np.testing.assert_allclose(np.asarray(out_small),
                               np.asarray(_reference(x_small, W, b, weights)),
                               rtol=1e-5, atol=1e-5)

    # 2) Larger batch -> batch-tiled, "parallel" grid path (512-row tiles, 2 steps).
    x_big = jax.random.normal(kx2, (1024, H), dtype=jnp.float32)
    out_big = jax.block_until_ready(
        ensemble_weighted_forward(x_big, W_fused, b_fused, weights,
                                  num_models=M, num_classes=C))
    np.testing.assert_allclose(np.asarray(out_big),
                               np.asarray(_reference(x_big, W, b, weights)),
                               rtol=1e-5, atol=1e-5)

    print("KERNEL_OK")
</pallas_src>

<mosaic_0001>
module attributes {stable_mosaic.version = 11 : i64} {
  func.func @_ensemble_kernel(%arg0: memref<3xf32, #tpu.memory_space<smem>>, %arg1: memref<8x32xf32, #tpu.memory_space<vmem>>, %arg2: memref<32x384xf32, #tpu.memory_space<vmem>>, %arg3: memref<1x384xf32, #tpu.memory_space<vmem>>, %arg4: memref<8x128xf32, #tpu.memory_space<vmem>>) attributes {dimension_semantics = [], scalar_prefetch = 0 : i64, scratch_operands = 0 : i64, tpu.core_type = #tpu.core_type<tc>} {
    %c0 = arith.constant 0 : index
    %c0_0 = arith.constant 0 : index
    %0 = vector.load %arg1[%c0, %c0_0] : memref<8x32xf32, #tpu.memory_space<vmem>>, vector<8x32xf32>
    %c0_1 = arith.constant 0 : index
    %c0_2 = arith.constant 0 : index
    %1 = vector.load %arg2[%c0_1, %c0_2] : memref<32x384xf32, #tpu.memory_space<vmem>>, vector<32x384xf32>
    %cst = arith.constant dense<0.000000e+00> : vector<8x384xf32>
    %2 = tpu.matmul %0, %1, %cst {dimension_numbers = #tpu.dot_dimension_numbers<[1], [0], [0], [1], [0, 0, 1, 1], [], []>} : vector<8x32xf32>, vector<32x384xf32>, vector<8x384xf32> -> vector<8x384xf32>
    %c0_3 = arith.constant 0 : index
    %c0_4 = arith.constant 0 : index
    %3 = vector.load %arg3[%c0_3, %c0_4] : memref<1x384xf32, #tpu.memory_space<vmem>>, vector<1x384xf32>
    %4 = vector.broadcast %3 : vector<1x384xf32> to vector<8x384xf32>
    %5 = arith.addf %2, %4 : vector<8x384xf32>
    %6 = vector.extract_strided_slice %5 {offsets = [0, 0], sizes = [8, 128], strides = [1, 1]} : vector<8x384xf32> to vector<8x128xf32>
    %cst_5 = arith.constant dense<0xFF800000> : vector<8xf32>
    %7 = vector.multi_reduction <maximumf>, %6, %cst_5 [1] : vector<8x128xf32> to vector<8xf32>
    %8 = vector.shape_cast %7 : vector<8xf32> to vector<8x1xf32>
    %9 = vector.broadcast %8 : vector<8x1xf32> to vector<8x128xf32>
    %10 = arith.subf %6, %9 : vector<8x128xf32>
    %11 = math.exp %10 : vector<8x128xf32>
    %cst_6 = arith.constant dense<0.000000e+00> : vector<8xf32>
    %12 = vector.multi_reduction <add>, %11, %cst_6 [1] : vector<8x128xf32> to vector<8xf32>
    %13 = vector.shape_cast %12 : vector<8xf32> to vector<8x1xf32>
    %14 = tpu.reciprocal %13 : vector<8x1xf32> -> vector<8x1xf32>
    %15 = vector.broadcast %14 : vector<8x1xf32> to vector<8x128xf32>
    %16 = arith.mulf %11, %15 : vector<8x128xf32>
    %17 = vector.extract_strided_slice %5 {offsets = [0, 128], sizes = [8, 128], strides = [1, 1]} : vector<8x384xf32> to vector<8x128xf32>
    %cst_7 = arith.constant dense<0xFF800000> : vector<8xf32>
    %18 = vector.multi_reduction <maximumf>, %17, %cst_7 [1] : vector<8x128xf32> to vector<8xf32>
    %19 = vector.shape_cast %18 : vector<8xf32> to vector<8x1xf32>
    %20 = vector.broadcast %19 : vector<8x1xf32> to vector<8x128xf32>
    %21 = arith.subf %17, %20 : vector<8x128xf32>
    %22 = math.exp %21 : vector<8x128xf32>
    %cst_8 = arith.constant dense<0.000000e+00> : vector<8xf32>
    %23 = vector.multi_reduction <add>, %22, %cst_8 [1] : vector<8x128xf32> to vector<8xf32>
    %24 = vector.shape_cast %23 : vector<8xf32> to vector<8x1xf32>
    %25 = tpu.reciprocal %24 : vector<8x1xf32> -> vector<8x1xf32>
    %c1 = arith.constant 1 : index
    %26 = memref.load %arg0[%c1] : memref<3xf32, #tpu.memory_space<smem>>
    %27 = vector.broadcast %26 : f32 to vector<8x1xf32>
    %28 = arith.mulf %27, %25 : vector<8x1xf32>
    %29 = vector.broadcast %28 : vector<8x1xf32> to vector<8x128xf32>
    %30 = arith.mulf %22, %29 : vector<8x128xf32>
    %31 = arith.addf %16, %30 : vector<8x128xf32>
    %32 = vector.extract_strided_slice %5 {offsets = [0, 256], sizes = [8, 128], strides = [1, 1]} : vector<8x384xf32> to vector<8x128xf32>
    %cst_9 = arith.constant dense<0xFF800000> : vector<8xf32>
    %33 = vector.multi_reduction <maximumf>, %32, %cst_9 [1] : vector<8x128xf32> to vector<8xf32>
    %34 = vector.shape_cast %33 : vector<8xf32> to vector<8x1xf32>
    %35 = vector.broadcast %34 : vector<8x1xf32> to vector<8x128xf32>
    %36 = arith.subf %32, %35 : vector<8x128xf32>
    %37 = math.exp %36 : vector<8x128xf32>
    %cst_10 = arith.constant dense<0.000000e+00> : vector<8xf32>
    %38 = vector.multi_reduction <add>, %37, %cst_10 [1] : vector<8x128xf32> to vector<8xf32>
    %39 = vector.shape_cast %38 : vector<8xf32> to vector<8x1xf32>
    %40 = tpu.reciprocal %39 : vector<8x1xf32> -> vector<8x1xf32>
    %c2 = arith.constant 2 : index
    %41 = memref.load %arg0[%c2] : memref<3xf32, #tpu.memory_space<smem>>
    %42 = vector.broadcast %41 : f32 to vector<8x1xf32>
    %43 = arith.mulf %42, %40 : vector<8x1xf32>
    %44 = vector.broadcast %43 : vector<8x1xf32> to vector<8x128xf32>
    %45 = arith.mulf %37, %44 : vector<8x128xf32>
    %46 = arith.addf %31, %45 : vector<8x128xf32>
    %c0_11 = arith.constant 0 : index
    %c0_12 = arith.constant 0 : index
    %47 = vector.load %arg4[%c0_11, %c0_12] : memref<8x128xf32, #tpu.memory_space<vmem>>, vector<8x128xf32>
    tpu.vector_store %arg4[%c0_11, %c0_12], %46 {strides = array<i32>} : memref<8x128xf32, #tpu.memory_space<vmem>>, vector<8x128xf32>,
    return
  }
}

</mosaic_0001>

<bundles_post_ra>
// kernel: tpu_custom_call.1
= control target key start
LH: loop header
LB: loop body
LE: loop exit
PB: predicated region body
PF: predicated region fallthrough
CT: control target
= control target key end

     0   :  { %9 = vsyncpa [#allocation5], 0  ;;  %s447_s0 = inlined_call_operand.hbm [shape: f32[3], index: 0, kind: input, shape index: {}]   ;;  %s448_s1 = inlined_call_operand.hbm [shape: f32[8,32], index: 1, kind: input, shape index: {}]   ;;  %s449_s2 = inlined_call_operand.hbm [shape: f32[32,384], index: 2, kind: input, shape index: {}]   ;;  %s450_s3 = inlined_call_operand.vmem [shape: f32[1,384], index: 3, kind: input, shape index: {}]   ;;  %s451_s4 = inlined_call_operand.hbm [shape: f32[8,128], index: 4, kind: output, shape index: {}]  }
   0x1   :  { %10 = vsyncpa [#allocation3], 0 }
   0x2   :  { %11 = vsyncpa [#allocation8], 0 }
   0x3   :  { %12 = vsyncpa [#allocation4], 0  ;;  %s399_s15 = smov [#allocation2]   ;;  %s400_s18 = smov [#allocation6]  }
   0x4   :  { %20 = dma.hbm_to_smem %s447_s0, 16, %s399_s15, [#allocation5]  }
   0x5   :  { %s27_s19 = sshll.u32 %s400_s18, 4  ;;  %s401_s20 = smov [#allocation7]   ;;  %s28_s19 = int_to_ptr.vmem [resolvable:$true] %s27_s19 }
   0x6   :  { %s36_s21 = sshll.u32 %s401_s20, 4  ;;  %s339_s22 = scalar_lea.vmem %s28_s19, 128  ;;  %s37_s21 = int_to_ptr.vmem [resolvable:$true] %s36_s21 }
   0x7   :  { %p340_p0 = scmp.ne.s32.totalorder %s28_s19, %s339_s22  ;;  %p344_p1 = scmp.lt.s32.totalorder %s28_s19, %s28_s19 }
   0x8   :  { %p345_p2 = scmp.lt.s32.totalorder %s339_s22, %s339_s22 }
   0xa   :  { %p346_p3 = por %p345_p2, %p344_p1 }
   0xc   :  { %p347_p4 = pnand %p346_p3, %p340_p0 }
   0xe   :  { %350 = shalt.err (!%p347_p4)
}
   0xf   :  { %30 = dma.hbm_to_vmem [thread:$0]  %s448_s1, 128, %s28_s19, [#allocation3]  }
  0x10   :  { %s359_s25 = scalar_lea.vmem %s37_s21, 1536  ;;  %p364_p6 = scmp.lt.s32.totalorder %s37_s21, %s37_s21 }
  0x11   :  { %p360_p5 = scmp.ne.s32.totalorder %s37_s21, %s359_s25  ;;  %p365_p7 = scmp.lt.s32.totalorder %s359_s25, %s359_s25 }
  0x13   :  { %p366_p8 = por %p365_p7, %p364_p6 }
  0x15   :  { %p367_p9 = pnand %p366_p8, %p360_p5 }
  0x17   :  { %370 = shalt.err (!%p367_p9)
}
  0x18   :  { %s402_s0 = smov 384   ;;  %s403_s26 = smov 24  }
  0x19   :  { %42 = dma.hbm_to_vmem [thread:$0]  %s449_s2, 1536, %s37_s21, [#allocation8], %s402_s0, %s402_s0, %s403_s26  }
  0x1a   :  { %391 = dma.done.wait [#allocation5], 16  }
  0x1b   :  { %392 = vsyncadd [#allocation5], 4294967280 }
  0x1c   :  { %393 = dma.done.wait [#allocation3], 128  }
  0x1d   :  { %394 = vsyncadd [#allocation3], 4294967168 }
  0x1e   :  { %395 = dma.done.wait [#allocation8], 1536  }
  0x1f   :  { %396 = vsyncadd [#allocation8], 4294965760 }
  0x20   :  { %54 = sfence }
  0x21   :  { %v66_v0 = vld [vmem:[#allocation7 + $0x50] sm:$0xff]  ;;  %v65_v1 = vld [vmem:[#allocation7 + $0x48] sm:$0xff]  ;;  %v67_v2 = vld [vmem:[#allocation7 + $0x58] sm:$0xff]  ;;  %v404_v3 = vmov 0.0   ;;  %vm85_vm0 = vcmask 261120   ;;  %vm405_vm1 = vmmov 0   ;;  %v70_v14 = vlaneseq }
  0x22   :  { %113 = vmatprep.subr.mxu0 %v66_v0  ;;  %292 = vmatprep.subr.mxu1 %v404_v3  ;;  %v63_v4 = vld [vmem:[#allocation7 + $0x38] sm:$0xff]  ;;  %v62_v5 = vld [vmem:[#allocation7 + $0x30] sm:$0xff]  ;;  %v64_v6 = vld [vmem:[#allocation7 + $0x40] sm:$0xff]  ;;  %s286_s29 = sld [smem:[#allocation2 + $0x2]]  ;;  %s406_s30 = smov [#allocation9]  }
  0x23   :  { %114 = vmatpush1.msra.mxu0 %v65_v1  ;;  %293 = vmatpush3.msra.mxu1 %v67_v2  ;;  %v60_v7 = vld [vmem:[#allocation7 + $0x20] sm:$0xff]  ;;  %v59_v8 = vld [vmem:[#allocation7 + $0x18] sm:$0xff]  ;;  %v61_v9 = vld [vmem:[#allocation7 + $0x28] sm:$0xff]  ;;  %v71_v15 = vshrl.u32 %v70_v14, 7  ;;  %s272_s5 = sshll.u32 %s406_s30, 4  ;;  %s273_s5 = int_to_ptr.vmem [resolvable:$true] %s272_s5 }
  0x24   :  { %115 = vmatprep.subr.mxu0 %v63_v4  ;;  %294 = vmatprep.subr.mxu1 %v404_v3  ;;  %v57_v10 = vld [vmem:[#allocation7 + $0x8] sm:$0xff]  ;;  %v56_v11 = vld [vmem:[#allocation7] sm:$0xff]  ;;  %v58_v12 = vld [vmem:[#allocation7 + $0x10] sm:$0xff]  ;;  %s371_s6 = scalar_lea.vmem %s273_s5, 128  ;;  %p376_p11 = scmp.lt.s32.totalorder %s273_s5, %s273_s5 }
  0x25   :  { %116 = vmatpush1.msra.mxu0 %v62_v5  ;;  %295 = vmatpush3.msra.mxu1 %v64_v6  ;;  %v55_v13 = vld [vmem:[#allocation6] sm:$0xff]  ;;  %v80_v16 = vsub.s32 2, %v71_v15  ;;  %v76_v18 = vsub.s32 1, %v71_v15  ;;  %v72_v20 = vsub.s32 0, %v71_v15  ;;  %p372_p10 = scmp.ne.s32.totalorder %s273_s5, %s371_s6  ;;  %p377_p12 = scmp.lt.s32.totalorder %s371_s6, %s371_s6 }
  0x26   :  { %117 = vmatprep.subr.mxu0 %v60_v7  ;;  %296 = vmatprep.subr.mxu1 %v404_v3  ;;  %v68_v17 = vld [vmem:[%s450_s3] sm:$0x7]  ;;  %s285_s3 = sld [smem:[#allocation2 + $0x1]] }
  0x27   :  { %118 = vmatpush1.msra.mxu0 %v59_v8  ;;  %297 = vmatpush3.msra.mxu1 %v61_v9  ;;  %v81_v19 = vrot.slane %v68_v17, %v80_v16  ;;  %v77_v21 = vrot.slane %v68_v17, %v76_v18  ;;  %v73_v27 = vrot.slane %v68_v17, %v72_v20  ;;  %p378_p13 = por %p377_p12, %p376_p11 }
  0x28   :  { %119 = vmatprep.subr.mxu0 %v57_v10  ;;  %298 = vmatprep.subr.mxu1 %v404_v3  ;;  %v261_v48 = vstv %s286_s29 }
  0x29   :  { %120 = vmatpush1.msra.mxu0 %v56_v11  ;;  %153 = vmatprep.mubr.f32.mxu0 %v404_v3  ;;  %p379_p0 = pnand %p378_p13, %p372_p10 }
  0x2a   :  { %299 = vmatpush3.msra.mxu1 %v58_v12  ;;  %300 = vmatprep.mubr.msk.f32.mxu1 %vm405_vm1, %v404_v3 }
  0x2b   :  { %283 = vmatmul.mubr.msk.f32.vlgmr.msra.gmra.mxu0 %vm85_vm0, %v55_v13  ;;  %301 = vmatmul.mubr.msk.f32.vlgmr.msra.gmra.mxu1 %vm85_vm0, %v55_v13 }
  0x2c   :  { %v248_v45 = vstv %s285_s3 }
  0xeb   :  { %v155_v22 = vpop.f32.mrf.mxu0  ;;  %v226_v23 = vpop.f32.mrf.mxu1 }
  0xec   :  { %v227_v24 = vadd.f32 %v226_v23, %v81_v19  ;;  %v156_v29 = vadd.f32 %v155_v22, %v73_v27 }
  0xed   :  { %v157_v25 = vpop.f32.mrf.mxu0  ;;  %v302_v26 = vpop.f32.mrf.mxu1 }
  0xee   :  { %v158_v28 = vadd.f32 %v157_v25, %v77_v21  ;;  %252 = vmax.xlane.f32.xlu1 %v227_v24 }
  0xf0   :  { %239 = vmax.xlane.f32.xlu0 %v158_v28 }
  0xf4   :  { %230 = vmax.xlane.f32.xlu0 %v156_v29 }
 0x177   :  { %v253_v30 = vpop.xlane.xlu1 %252 }
 0x178   :  { %v254_v31 = vsub.f32 %v227_v24, %v253_v30 }
 0x179   :  { %v240_v32 = vpop.xlane.xlu0 %239 }
 0x17a   :  { %v241_v33 = vsub.f32 %v158_v28, %v240_v32  ;;  %v255_v35 = vmul.f32 1.442695, %v254_v31 }
 0x17c   :  { %v242_v34 = vmul.f32 1.442695, %v241_v33 }
 0x17d   :  { %v231_v36 = vpop.xlane.xlu0 %230 }
 0x17e   :  { %311 = vpow2.f32 %v242_v34  ;;  %v232_v37 = vsub.f32 %v156_v29, %v231_v36 }
 0x17f   :  { %313 = vpow2.f32 %v255_v35 }
 0x180   :  { %v233_v38 = vmul.f32 1.442695, %v232_v37 }
 0x182   :  { %315 = vpow2.f32 %v233_v38 }
 0x18b   :  { %v312_v39 = vpop.eup %311 }
 0x18c   :  { %244 = vadd.xlane.f32.xlu1 %v312_v39  ;;  %v314_v40 = vpop.eup %313 }
 0x18f   :  { %v316_v41 = vpop.eup %315 }
 0x190   :  { %257 = vadd.xlane.f32.xlu1 %v314_v40  ;;  %235 = vadd.xlane.f32.xlu0 %v316_v41 }
 0x215   :  { %v245_v42 = vpop.xlane.xlu1 %244 }
 0x216   :  { %317 = vrcp.f32 %v245_v42 }
 0x219   :  { %v258_v43 = vpop.xlane.xlu1 %257  ;;  %v236_v44 = vpop.xlane.xlu0 %235 }
 0x21a   :  { %319 = vrcp.f32 %v258_v43 }
 0x21b   :  { %321 = vrcp.f32 %v236_v44 }
 0x223   :  { %v318_v46 = vpop.eup %317 }
 0x224   :  { %v249_v47 = vmul.f32 %v318_v46, %v248_v45 }
 0x226   :  { %v250_v53 = vmul.f32 %v312_v39, %v249_v47 }
 0x227   :  { %v320_v49 = vpop.eup %319 }
 0x228   :  { %v322_v50 = vpop.eup %321  ;;  %v262_v51 = vmul.f32 %v320_v49, %v261_v48 }
 0x229   :  { %v238_v52 = vmul.f32 %v322_v50, %v316_v41 }
 0x22a   :  { %v263_v54 = vmul.f32 %v314_v40, %v262_v51 }
 0x22b   :  { %v251_v55 = vadd.f32 %v250_v53, %v238_v52 }
 0x22d   :  { %v264_v56 = vadd.f32 %v263_v54, %v251_v55 }
 0x22f   :  { %265 = vst [vmem:[#allocation9] sm:$0xff] %v264_v56 }
 0x230   :  { %382 = shalt.err (!%p379_p0)
}
 0x231   :  { %275 = dma.vmem_to_hbm [thread:$0]  %s273_s5, 128, %s451_s4, [#allocation4]  }
 0x232   :  { %397 = dma.done.wait [#allocation4], 128  }
 0x233   :  { %398 = vsyncadd [#allocation4], 4294967168 }
 0x234   :  { %279 = vsyncpa [#allocation3], 1 }
 0x235   :  { %280 = vsyncpa [#allocation8], 1 }
 0x236   :  { %281 = vsyncpa [#allocation4], 1 }
 0x237   :  { %282 = vsyncpa [#allocation5], 1 }

</bundles_post_ra>
